<compile_context>
chip_gen: v6e
topology: v6e:2x2x1
jax: 0.10.0
libtpu: 0.0.40
codegen_flags: <defaults>
</compile_context>

<pallas_src>
import functools

import jax
import jax.numpy as jnp
from jax.experimental import pallas as pl
from jax.experimental.pallas import tpu as pltpu

IN_EPS = 1e-3   # InstanceNorm2d eps from the module
BN_EPS = 1e-5   # BatchNorm2d default eps


def _fold_bn(gamma, beta, rmean, rvar):
    """Eval-mode BatchNorm2d folded into y = x * s + h."""
    s = gamma / jnp.sqrt(rvar + BN_EPS)
    return s, beta - rmean * s


def _round_up(x, m):
    return ((x + m - 1) // m) * m


def oafilter_kernel(x_ref,
                    s1_ref, h1_ref, w1_ref, b1_ref,
                    s2_ref, h2_ref, w2_ref, b2_ref,
                    s3_ref, h3_ref, w3_ref, b3_ref,
                    o_ref, *, n_true, c_true):
    """R batch rows per grid step; everything stays in (Np, Cp) layout (lanes = channels)."""
    bf16 = jnp.bfloat16
    R, Np, Cp = x_ref.shape
    inv_n = 1.0 / n_true

    s1, h1, b1 = s1_ref[...], h1_ref[...], b1_ref[...]          # (1, Cp)
    s2, h2, b2 = s2_ref[...], h2_ref[...], b2_ref[...]          # (Np, 1)
    s3, h3, b3 = s3_ref[...], h3_ref[...], b3_ref[...]          # (1, Cp)

    # Validity masks for padded channel lanes / padded point rows (static; zero cost
    # when there is no padding).
    cmask = None
    if c_true != Cp:
        cmask = jax.lax.broadcasted_iota(jnp.int32, (1, Cp), 1) < c_true
    rmask = None
    if n_true != Np:
        rmask = jax.lax.broadcasted_iota(jnp.int32, (Np, 1), 0) < n_true

    xs = [x_ref[r] for r in range(R)]                            # R x (Np, Cp) f32

    # ---- conv1: InstanceNorm + folded BN fused into one scale/shift (single-pass stats),
    #      ReLU, 1x1 conv over channels.  All R rows share one (R*Np, Cp) MXU dot.
    a1s = []
    for x in xs:
        mu = jnp.sum(x, axis=0, keepdims=True) * inv_n           # padded rows are zero
        ex2 = jnp.sum(x * x, axis=0, keepdims=True) * inv_n
        var = jnp.maximum(ex2 - mu * mu, 0.0)
        scale = s1 * jax.lax.rsqrt(var + IN_EPS)
        shift = h1 - mu * scale
        a1s.append(jnp.maximum(x * scale + shift, 0.0))
    a1 = a1s[0] if R == 1 else jnp.concatenate(a1s, axis=0)      # (R*Np, Cp)
    t_cat = jnp.dot(a1.astype(bf16), w1_ref[...],
                    preferred_element_type=jnp.float32) + b1     # (R*Np, Cp)
    ts = [t_cat] if R == 1 else [t_cat[r * Np:(r + 1) * Np] for r in range(R)]

    # ---- conv2 + residual, transpose-free:
    #      trans(1,2) -> BN(points) -> ReLU -> Conv1x1(points) -> trans(1,2)
    #      == W2 @ relu(t * s2_col + h2_col) + b2_col  in (Np, Cp) layout.
    #      For R=2 the RHS is lane-concatenated to (Np, 2*Cp): 256 MXU output lanes.
    a2s = [jnp.maximum(t * s2 + h2, 0.0).astype(bf16) for t in ts]
    a2 = a2s[0] if R == 1 else jnp.concatenate(a2s, axis=1)      # (Np, R*Cp)
    v2 = jnp.dot(w2_ref[...], a2,
                 preferred_element_type=jnp.float32) + b2        # (Np, R*Cp)

    us = []
    for r in range(R):
        u = ts[r] + (v2 if R == 1 else v2[:, r * Cp:(r + 1) * Cp])
        if cmask is not None:                                    # scrub padded lanes
            u = jnp.where(cmask, u, 0.0)
        if rmask is not None:                                    # scrub padded rows
            u = jnp.where(rmask, u, 0.0)
        us.append(u)

    # ---- conv3: InstanceNorm + folded BN (fused), ReLU, 1x1 conv over channels.
    a3s = []
    for u in us:
        mu3 = jnp.sum(u, axis=0, keepdims=True) * inv_n
        ex23 = jnp.sum(u * u, axis=0, keepdims=True) * inv_n
        var3 = jnp.maximum(ex23 - mu3 * mu3, 0.0)
        scale3 = s3 * jax.lax.rsqrt(var3 + IN_EPS)
        shift3 = h3 - mu3 * scale3
        a3s.append(jnp.maximum(u * scale3 + shift3, 0.0))
    a3 = a3s[0] if R == 1 else jnp.concatenate(a3s, axis=0)      # (R*Np, Cp)
    w_cat = jnp.dot(a3.astype(bf16), w3_ref[...],
                    preferred_element_type=jnp.float32) + b3     # (R*Np, Cp)

    for r in range(R):
        w_r = w_cat if R == 1 else w_cat[r * Np:(r + 1) * Np]
        o_ref[r] = w_r + xs[r]                                   # identity shortcut


def prepare_params(C, N, bn1, W1, b1, bn2, W2, b2, bn3, W3, b3):
    """Fold eval-mode BNs, zero-pad to aligned (Np, Cp) shapes, pre-cast matmul weights."""
    Cp = _round_up(C, 128)
    Np = _round_up(max(N, 8), 8)
    pc, pn = Cp - C, Np - N

    s1, h1 = _fold_bn(*bn1)
    s2, h2 = _fold_bn(*bn2)
    s3, h3 = _fold_bn(*bn3)

    def chan_vec(v):                       # (C,) -> (1, Cp) f32, zero-padded
        v = v.astype(jnp.float32)
        return (jnp.pad(v, (0, pc)) if pc else v)[None, :]

    def chan_mat(W):                       # torch (out,in) -> (Cp_in, Cp_out) bf16, zero-padded
        W = W.T.astype(jnp.float32)
        if pc:
            W = jnp.pad(W, ((0, pc), (0, pc)))
        return W.astype(jnp.bfloat16)

    def point_vec(v):                      # (N,) -> (Np, 1) f32, zero-padded column
        v = v.astype(jnp.float32)
        return (jnp.pad(v, (0, pn)) if pn else v)[:, None]

    W2p = W2.astype(jnp.float32)
    if pn:
        W2p = jnp.pad(W2p, ((0, pn), (0, pn)))
    W2p = W2p.astype(jnp.bfloat16)

    params = (chan_vec(s1), chan_vec(h1), chan_mat(W1), chan_vec(b1),
              point_vec(s2), point_vec(h2), W2p, point_vec(b2),
              chan_vec(s3), chan_vec(h3), chan_mat(W3), chan_vec(b3))
    return params, Cp, Np


def _default_rows_per_step(B):
    """2 rows/step only where the lane-concat trick helps: 256-wide-MXU chips (v6e/v7x),
    even B, and enough grid steps left (>=2) so both v7x TensorCores stay busy."""
    try:
        kind = jax.devices()[0].device_kind.lower()
    except Exception:
        kind = ""
    narrow_mxu = any(k in kind for k in ("v2", "v3", "v4", "v5"))
    if (not narrow_mxu) and B % 2 == 0 and B >= 4:
        return 2
    return 1


def oafilter_apply(xp, params, *, n_true, c_true, rows_per_step=None):
    """Run one OAFilter block on lane-dense activations.

    xp: (B, Np, Cp) float32, channels last, zero-padded.  Chain this directly when
    stacking OAFilter blocks so the NCHW<->NHC transpose/pad happens once per network.
    """
    B, Np, Cp = xp.shape
    R = rows_per_step if rows_per_step else _default_rows_per_step(B)
    if B % R:
        R = 1
    grid = (B // R,)

    kernel = functools.partial(oafilter_kernel, n_true=n_true, c_true=c_true)

    # Constant index_map -> never re-fetched across the grid -> single buffer is enough.
    def const(shape):
        return pl.BlockSpec(shape, lambda b: (0, 0), pipeline_mode=pl.Buffered(1))

    (s1, h1, W1, b1, s2, h2, W2, b2, s3, h3, W3, b3) = params

    flops = 2 * B * (2 * Np * Cp * Cp + Np * Np * Cp)
    bytes_accessed = (2 * B * Np * Cp) * 4 + (2 * Cp * Cp + Np * Np) * 2 + (8 * Cp + 4 * Np) * 4

    # Right-size the scoped-VMEM request: streamed x/out (double-buffered) + live f32
    # intermediates + single-buffered weights, with ~50% headroom; never claim the full
    # 64 MiB of a v7x TensorCore.
    act = R * Np * Cp * 4
    want = int(1.5 * (2 * 2 * act + 8 * act
                      + 2 * Cp * Cp * 2 + Np * Np * 2 + 64 * 1024))
    vmem_limit = max(32 * 1024 * 1024, min(want, 48 * 1024 * 1024))

    return pl.pallas_call(
        kernel,
        out_shape=jax.ShapeDtypeStruct((B, Np, Cp), jnp.float32),
        grid_spec=pltpu.PrefetchScalarGridSpec(
            num_scalar_prefetch=0,
            grid=grid,                                   # R batch rows per step
            in_specs=[
                pl.BlockSpec((R, Np, Cp), lambda b: (b, 0, 0)),                              # x
                const((1, Cp)), const((1, Cp)), const((Cp, Cp)), const((1, Cp)),             # conv1
                const((Np, 1)), const((Np, 1)), const((Np, Np)), const((Np, 1)),             # conv2
                const((1, Cp)), const((1, Cp)), const((Cp, Cp)), const((1, Cp)),             # conv3
            ],
            out_specs=pl.BlockSpec((R, Np, Cp), lambda b: (b, 0, 0)),
        ),
        compiler_params=pltpu.CompilerParams(
            dimension_semantics=("parallel",),
            vmem_limit_bytes=vmem_limit,
        ),
        cost_estimate=pl.CostEstimate(
            flops=flops, transcendentals=2 * B * Cp, bytes_accessed=bytes_accessed),
    )(xp, s1, h1, W1, b1, s2, h2, W2, b2, s3, h3, W3, b3)


def oafilter_forward(x_nchw, bn1, W1, b1, bn2, W2, b2, bn3, W3, b3, rows_per_step=None):
    """Drop-in forward for OAFilter (eval-mode BN).

    x_nchw: (B, C, N, 1) float32 (torch NCHW with W == 1).
    bn*: (gamma, beta, running_mean, running_var); W1/W3: (C, C); W2: (N, N).
    """
    B, C, N, Wd = x_nchw.shape
    assert Wd == 1

    params, Cp, Np = prepare_params(C, N, bn1, W1, b1, bn2, W2, b2, bn3, W3, b3)

    # Single layout round trip per call (use oafilter_apply directly to stack blocks).
    x_bnc = jnp.transpose(x_nchw[..., 0], (0, 2, 1)).astype(jnp.float32)
    if Cp != C or Np != N:
        x_bnc = jnp.pad(x_bnc, ((0, 0), (0, Np - N), (0, Cp - C)))

    out = oafilter_apply(x_bnc, params, n_true=N, c_true=C, rows_per_step=rows_per_step)

    if Cp != C or Np != N:
        out = out[:, :N, :C]
    return jnp.transpose(out, (0, 2, 1))[..., None]


# ---------------- pure-JAX references (for validation) ----------------
def torch_ref(x, bn1, W1, b1, bn2, W2, b2, bn3, W3, b3):
    """Literal torch-semantics reference in NCHW, all f32 (eval-mode BN)."""
    def instnorm(t):
        mu = t.mean(axis=(2, 3), keepdims=True)
        var = ((t - mu) ** 2).mean(axis=(2, 3), keepdims=True)
        return (t - mu) / jnp.sqrt(var + IN_EPS)

    def bn(t, p):
        g, be, rm, rv = (v[None, :, None, None] for v in p)
        return (t - rm) / jnp.sqrt(rv + BN_EPS) * g + be

    def conv1x1(t, W, b):
        return jnp.einsum('bihw,oi->bohw', t, W) + b[None, :, None, None]

    out = conv1x1(jnp.maximum(bn(instnorm(x), bn1), 0.0), W1, b1)
    out = out.transpose(0, 2, 1, 3)                 # trans(1,2)
    out = out + conv1x1(jnp.maximum(bn(out, bn2), 0.0), W2, b2)
    out = out.transpose(0, 2, 1, 3)                 # trans(1,2)
    out = conv1x1(jnp.maximum(bn(instnorm(out), bn3), 0.0), W3, b3)
    return out + x


def kernel_math_ref(x_nchw, bn1, W1, b1, bn2, W2, b2, bn3, W3, b3):
    """Pure-JAX mirror of the exact in-kernel math (fused norms, clamped var, bf16 matmuls)."""
    bf16 = jnp.bfloat16
    x = jnp.transpose(x_nchw[..., 0], (0, 2, 1)).astype(jnp.float32)   # (B, N, C)
    s1, h1 = _fold_bn(*bn1)
    s2, h2 = _fold_bn(*bn2)
    s3, h3 = _fold_bn(*bn3)
    s1r, h1r, b1r = s1[None, None, :], h1[None, None, :], b1[None, None, :]
    s3r, h3r, b3r = s3[None, None, :], h3[None, None, :], b3[None, None, :]
    s2c, h2c, b2c = s2[None, :, None], h2[None, :, None], b2[None, :, None]

    def cdot(a, w):   # channel-contraction, bf16 operands, f32 accumulation
        return jnp.einsum('bnc,cd->bnd', a.astype(bf16), w.T.astype(bf16),
                          preferred_element_type=jnp.float32)

    mu = x.mean(axis=1, keepdims=True)
    var = jnp.maximum((x * x).mean(axis=1, keepdims=True) - mu * mu, 0.0)
    scale = s1r * jax.lax.rsqrt(var + IN_EPS)
    a1 = jnp.maximum(x * scale + (h1r - mu * scale), 0.0)
    t = cdot(a1, W1) + b1r

    a2 = jnp.maximum(t * s2c + h2c, 0.0)
    v2 = jnp.einsum('mn,bnc->bmc', W2.astype(bf16), a2.astype(bf16),
                    preferred_element_type=jnp.float32) + b2c
    u = t + v2

    mu3 = u.mean(axis=1, keepdims=True)
    var3 = jnp.maximum((u * u).mean(axis=1, keepdims=True) - mu3 * mu3, 0.0)
    scale3 = s3r * jax.lax.rsqrt(var3 + IN_EPS)
    a3 = jnp.maximum(u * scale3 + (h3r - mu3 * scale3), 0.0)
    w = cdot(a3, W3) + b3r

    return jnp.transpose(w + x, (0, 2, 1))[..., None]


def _run_case(key, B, C, N, loose_tol, rows_per_step=None):
    ks = jax.random.split(key, 20)
    x_nchw = jax.random.normal(ks[0], (B, C, N, 1), jnp.float32)

    def bn_params(kg, kb, km, kv, dim):
        g = 1.0 + 0.5 * jax.random.normal(kg, (dim,), jnp.float32)
        be = 0.1 * jax.random.normal(kb, (dim,), jnp.float32)
        rm = 0.1 * jax.random.normal(km, (dim,), jnp.float32)
        rv = jax.random.uniform(kv, (dim,), jnp.float32, minval=0.5, maxval=1.5)
        return g, be, rm, rv

    bn1 = bn_params(ks[1], ks[2], ks[3], ks[4], C)
    W1 = 0.2 * jax.random.normal(ks[5], (C, C), jnp.float32)
    b1 = 0.1 * jax.random.normal(ks[6], (C,), jnp.float32)
    bn2 = bn_params(ks[7], ks[8], ks[9], ks[10], N)
    W2 = 0.2 * jax.random.normal(ks[11], (N, N), jnp.float32)
    b2 = 0.1 * jax.random.normal(ks[12], (N,), jnp.float32)
    bn3 = bn_params(ks[13], ks[14], ks[15], ks[16], C)
    W3 = 0.2 * jax.random.normal(ks[17], (C, C), jnp.float32)
    b3 = 0.1 * jax.random.normal(ks[18], (C,), jnp.float32)

    params = (bn1, W1, b1, bn2, W2, b2, bn3, W3, b3)

    out = jax.block_until_ready(
        oafilter_forward(x_nchw, *params, rows_per_step=rows_per_step))
    assert out.shape == x_nchw.shape

    # Tight check: kernel vs a pure-JAX mirror of the exact in-kernel math (bf16 matmuls).
    mirror = kernel_math_ref(x_nchw, *params)
    assert jnp.allclose(out, mirror, rtol=2e-3, atol=2e-3), (
        float(jnp.max(jnp.abs(out - mirror))))

    # Sanity check: kernel (bf16 matmul operands) vs the full-f32 torch-semantics reference.
    ref = torch_ref(x_nchw, *params)
    rel = jnp.linalg.norm(out - ref) / jnp.linalg.norm(ref)
    assert float(rel) < loose_tol, float(rel)


if __name__ == "__main__":
    key = jax.random.PRNGKey(0)
    k1, k2, k3 = jax.random.split(key, 3)
    # Lane-dense case: C = 128 (OANet channel width), N multiple of 8, default rows/step.
    _run_case(k1, B=2, C=128, N=64, loose_tol=0.05)
    # Padding path: C < 128 padded to 128 lanes, N = 30 padded to 32 rows (masked stats).
    _run_case(k2, B=2, C=16, N=30, loose_tol=0.05)
    # 2-rows-per-step path (conv2 lane-concat -> 256 MXU output lanes), forced so the
    # path is exercised regardless of which TPU generation runs the test.
    _run_case(k3, B=4, C=128, N=64, loose_tol=0.05, rows_per_step=2)
    print("KERNEL_OK")
</pallas_src>

<mosaic_0001>
module attributes {stable_mosaic.version = 11 : i64} {
  func.func @oafilter_kernel(%arg0: i32, %arg1: memref<1x64x128xf32, #tpu.memory_space<vmem>>, %arg2: memref<1x128xf32, #tpu.memory_space<vmem>>, %arg3: memref<1x128xf32, #tpu.memory_space<vmem>>, %arg4: memref<128x128xbf16, #tpu.memory_space<vmem>>, %arg5: memref<1x128xf32, #tpu.memory_space<vmem>>, %arg6: memref<64x1xf32, #tpu.memory_space<vmem>>, %arg7: memref<64x1xf32, #tpu.memory_space<vmem>>, %arg8: memref<64x64xbf16, #tpu.memory_space<vmem>>, %arg9: memref<64x1xf32, #tpu.memory_space<vmem>>, %arg10: memref<1x128xf32, #tpu.memory_space<vmem>>, %arg11: memref<1x128xf32, #tpu.memory_space<vmem>>, %arg12: memref<128x128xbf16, #tpu.memory_space<vmem>>, %arg13: memref<1x128xf32, #tpu.memory_space<vmem>>, %arg14: memref<1x64x128xf32, #tpu.memory_space<vmem>>) attributes {dimension_semantics = [#tpu.dimension_semantics<parallel>], iteration_bounds = array<i64: 2>, scalar_prefetch = 0 : i64, scratch_operands = 0 : i64, tpu.core_type = #tpu.core_type<tc>, window_params = [{transform_indices = @transform_0, window_bounds = array<i64: 1, 64, 128>}, {pipeline_mode = #tpu.pipeline_mode<synchronous>, transform_indices = @transform_1, window_bounds = array<i64: 1, 128>}, {pipeline_mode = #tpu.pipeline_mode<synchronous>, transform_indices = @transform_2, window_bounds = array<i64: 1, 128>}, {pipeline_mode = #tpu.pipeline_mode<synchronous>, transform_indices = @transform_3, window_bounds = array<i64: 128, 128>}, {pipeline_mode = #tpu.pipeline_mode<synchronous>, transform_indices = @transform_4, window_bounds = array<i64: 1, 128>}, {pipeline_mode = #tpu.pipeline_mode<synchronous>, transform_indices = @transform_5, window_bounds = array<i64: 64, 1>}, {pipeline_mode = #tpu.pipeline_mode<synchronous>, transform_indices = @transform_6, window_bounds = array<i64: 64, 1>}, {pipeline_mode = #tpu.pipeline_mode<synchronous>, transform_indices = @transform_7, window_bounds = array<i64: 64, 64>}, {pipeline_mode = #tpu.pipeline_mode<synchronous>, transform_indices = @transform_8, window_bounds = array<i64: 64, 1>}, {pipeline_mode = #tpu.pipeline_mode<synchronous>, transform_indices = @transform_9, window_bounds = array<i64: 1, 128>}, {pipeline_mode = #tpu.pipeline_mode<synchronous>, transform_indices = @transform_10, window_bounds = array<i64: 1, 128>}, {pipeline_mode = #tpu.pipeline_mode<synchronous>, transform_indices = @transform_11, window_bounds = array<i64: 128, 128>}, {pipeline_mode = #tpu.pipeline_mode<synchronous>, transform_indices = @transform_12, window_bounds = array<i64: 1, 128>}, {transform_indices = @transform_13, window_bounds = array<i64: 1, 64, 128>}]} {
    %c0 = arith.constant 0 : index
    %c0_0 = arith.constant 0 : index
    %0 = vector.load %arg2[%c0, %c0_0] : memref<1x128xf32, #tpu.memory_space<vmem>>, vector<1x128xf32>
    %c0_1 = arith.constant 0 : index
    %c0_2 = arith.constant 0 : index
    %1 = vector.load %arg3[%c0_1, %c0_2] : memref<1x128xf32, #tpu.memory_space<vmem>>, vector<1x128xf32>
    %c0_3 = arith.constant 0 : index
    %c0_4 = arith.constant 0 : index
    %2 = vector.load %arg5[%c0_3, %c0_4] : memref<1x128xf32, #tpu.memory_space<vmem>>, vector<1x128xf32>
    %c0_5 = arith.constant 0 : index
    %c0_6 = arith.constant 0 : index
    %3 = vector.load %arg6[%c0_5, %c0_6] : memref<64x1xf32, #tpu.memory_space<vmem>>, vector<64x1xf32>
    %c0_7 = arith.constant 0 : index
    %c0_8 = arith.constant 0 : index
    %4 = vector.load %arg7[%c0_7, %c0_8] : memref<64x1xf32, #tpu.memory_space<vmem>>, vector<64x1xf32>
    %c0_9 = arith.constant 0 : index
    %c0_10 = arith.constant 0 : index
    %5 = vector.load %arg9[%c0_9, %c0_10] : memref<64x1xf32, #tpu.memory_space<vmem>>, vector<64x1xf32>
    %c0_11 = arith.constant 0 : index
    %c0_12 = arith.constant 0 : index
    %6 = vector.load %arg10[%c0_11, %c0_12] : memref<1x128xf32, #tpu.memory_space<vmem>>, vector<1x128xf32>
    %c0_13 = arith.constant 0 : index
    %c0_14 = arith.constant 0 : index
    %7 = vector.load %arg11[%c0_13, %c0_14] : memref<1x128xf32, #tpu.memory_space<vmem>>, vector<1x128xf32>
    %c0_15 = arith.constant 0 : index
    %c0_16 = arith.constant 0 : index
    %8 = vector.load %arg13[%c0_15, %c0_16] : memref<1x128xf32, #tpu.memory_space<vmem>>, vector<1x128xf32>
    %c0_17 = arith.constant 0 : index
    %c0_18 = arith.constant 0 : index
    %c0_19 = arith.constant 0 : index
    %9 = vector.load %arg1[%c0_17, %c0_18, %c0_19] : memref<1x64x128xf32, #tpu.memory_space<vmem>>, vector<1x64x128xf32>
    %10 = vector.shape_cast %9 : vector<1x64x128xf32> to vector<64x128xf32>
    %cst = arith.constant dense<0.000000e+00> : vector<128xf32>
    %11 = vector.multi_reduction <add>, %10, %cst [0] : vector<64x128xf32> to vector<128xf32>
    %12 = vector.shape_cast %11 : vector<128xf32> to vector<1x128xf32>
    %cst_20 = arith.constant 1.562500e-02 : f32
    %13 = vector.broadcast %cst_20 : f32 to vector<1x128xf32>
    %14 = arith.mulf %12, %13 : vector<1x128xf32>
    %15 = arith.mulf %10, %10 : vector<64x128xf32>
    %cst_21 = arith.constant dense<0.000000e+00> : vector<128xf32>
    %16 = vector.multi_reduction <add>, %15, %cst_21 [0] : vector<64x128xf32> to vector<128xf32>
    %17 = vector.shape_cast %16 : vector<128xf32> to vector<1x128xf32>
    %cst_22 = arith.constant 1.562500e-02 : f32
    %18 = vector.broadcast %cst_22 : f32 to vector<1x128xf32>
    %19 = arith.mulf %17, %18 : vector<1x128xf32>
    %20 = arith.mulf %14, %14 : vector<1x128xf32>
    %21 = arith.subf %19, %20 : vector<1x128xf32>
    %cst_23 = arith.constant 0.000000e+00 : f32
    %22 = vector.broadcast %cst_23 : f32 to vector<1x128xf32>
    %23 = arith.maximumf %21, %22 : vector<1x128xf32>
    %cst_24 = arith.constant 1.000000e-03 : f32
    %24 = vector.broadcast %cst_24 : f32 to vector<1x128xf32>
    %25 = arith.addf %23, %24 : vector<1x128xf32>
    %26 = math.rsqrt %25 : vector<1x128xf32>
    %27 = arith.mulf %0, %26 : vector<1x128xf32>
    %28 = arith.mulf %14, %27 : vector<1x128xf32>
    %29 = arith.subf %1, %28 : vector<1x128xf32>
    %30 = vector.broadcast %27 : vector<1x128xf32> to vector<64x128xf32>
    %31 = arith.mulf %10, %30 : vector<64x128xf32>
    %32 = vector.broadcast %29 : vector<1x128xf32> to vector<64x128xf32>
    %33 = arith.addf %31, %32 : vector<64x128xf32>
    %cst_25 = arith.constant 0.000000e+00 : f32
    %34 = vector.broadcast %cst_25 : f32 to vector<64x128xf32>
    %35 = arith.maximumf %33, %34 : vector<64x128xf32>
    %36 = arith.truncf %35 : vector<64x128xf32> to vector<64x128xbf16>
    %c0_26 = arith.constant 0 : index
    %c0_27 = arith.constant 0 : index
    %37 = vector.load %arg4[%c0_26, %c0_27] : memref<128x128xbf16, #tpu.memory_space<vmem>>, vector<128x128xbf16>
    %cst_28 = arith.constant dense<0.000000e+00> : vector<64x128xf32>
    %38 = tpu.matmul %36, %37, %cst_28 {dimension_numbers = #tpu.dot_dimension_numbers<[1], [0], [0], [1], [0, 0, 1, 1], [], []>} : vector<64x128xbf16>, vector<128x128xbf16>, vector<64x128xf32> -> vector<64x128xf32>
    %39 = vector.broadcast %2 : vector<1x128xf32> to vector<64x128xf32>
    %40 = arith.addf %38, %39 : vector<64x128xf32>
    %41 = vector.broadcast %3 : vector<64x1xf32> to vector<64x128xf32>
    %42 = arith.mulf %40, %41 : vector<64x128xf32>
    %43 = vector.broadcast %4 : vector<64x1xf32> to vector<64x128xf32>
    %44 = arith.addf %42, %43 : vector<64x128xf32>
    %cst_29 = arith.constant 0.000000e+00 : f32
    %45 = vector.broadcast %cst_29 : f32 to vector<64x128xf32>
    %46 = arith.maximumf %44, %45 : vector<64x128xf32>
    %47 = arith.truncf %46 : vector<64x128xf32> to vector<64x128xbf16>
    %c0_30 = arith.constant 0 : index
    %c0_31 = arith.constant 0 : index
    %48 = vector.load %arg8[%c0_30, %c0_31] : memref<64x64xbf16, #tpu.memory_space<vmem>>, vector<64x64xbf16>
    %cst_32 = arith.constant dense<0.000000e+00> : vector<64x128xf32>
    %49 = tpu.matmul %48, %47, %cst_32 {dimension_numbers = #tpu.dot_dimension_numbers<[1], [0], [0], [1], [0, 0, 1, 1], [], []>} : vector<64x64xbf16>, vector<64x128xbf16>, vector<64x128xf32> -> vector<64x128xf32>
    %50 = vector.broadcast %5 : vector<64x1xf32> to vector<64x128xf32>
    %51 = arith.addf %49, %50 : vector<64x128xf32>
    %52 = arith.addf %40, %51 : vector<64x128xf32>
    %cst_33 = arith.constant dense<0.000000e+00> : vector<128xf32>
    %53 = vector.multi_reduction <add>, %52, %cst_33 [0] : vector<64x128xf32> to vector<128xf32>
    %54 = vector.shape_cast %53 : vector<128xf32> to vector<1x128xf32>
    %cst_34 = arith.constant 1.562500e-02 : f32
    %55 = vector.broadcast %cst_34 : f32 to vector<1x128xf32>
    %56 = arith.mulf %54, %55 : vector<1x128xf32>
    %57 = arith.mulf %52, %52 : vector<64x128xf32>
    %cst_35 = arith.constant dense<0.000000e+00> : vector<128xf32>
    %58 = vector.multi_reduction <add>, %57, %cst_35 [0] : vector<64x128xf32> to vector<128xf32>
    %59 = vector.shape_cast %58 : vector<128xf32> to vector<1x128xf32>
    %cst_36 = arith.constant 1.562500e-02 : f32
    %60 = vector.broadcast %cst_36 : f32 to vector<1x128xf32>
    %61 = arith.mulf %59, %60 : vector<1x128xf32>
    %62 = arith.mulf %56, %56 : vector<1x128xf32>
    %63 = arith.subf %61, %62 : vector<1x128xf32>
    %cst_37 = arith.constant 0.000000e+00 : f32
    %64 = vector.broadcast %cst_37 : f32 to vector<1x128xf32>
    %65 = arith.maximumf %63, %64 : vector<1x128xf32>
    %cst_38 = arith.constant 1.000000e-03 : f32
    %66 = vector.broadcast %cst_38 : f32 to vector<1x128xf32>
    %67 = arith.addf %65, %66 : vector<1x128xf32>
    %68 = math.rsqrt %67 : vector<1x128xf32>
    %69 = arith.mulf %6, %68 : vector<1x128xf32>
    %70 = arith.mulf %56, %69 : vector<1x128xf32>
    %71 = arith.subf %7, %70 : vector<1x128xf32>
    %72 = vector.broadcast %69 : vector<1x128xf32> to vector<64x128xf32>
    %73 = arith.mulf %52, %72 : vector<64x128xf32>
    %74 = vector.broadcast %71 : vector<1x128xf32> to vector<64x128xf32>
    %75 = arith.addf %73, %74 : vector<64x128xf32>
    %cst_39 = arith.constant 0.000000e+00 : f32
    %76 = vector.broadcast %cst_39 : f32 to vector<64x128xf32>
    %77 = arith.maximumf %75, %76 : vector<64x128xf32>
    %78 = arith.truncf %77 : vector<64x128xf32> to vector<64x128xbf16>
    %c0_40 = arith.constant 0 : index
    %c0_41 = arith.constant 0 : index
    %79 = vector.load %arg12[%c0_40, %c0_41] : memref<128x128xbf16, #tpu.memory_space<vmem>>, vector<128x128xbf16>
    %cst_42 = arith.constant dense<0.000000e+00> : vector<64x128xf32>
    %80 = tpu.matmul %78, %79, %cst_42 {dimension_numbers = #tpu.dot_dimension_numbers<[1], [0], [0], [1], [0, 0, 1, 1], [], []>} : vector<64x128xbf16>, vector<128x128xbf16>, vector<64x128xf32> -> vector<64x128xf32>
    %81 = vector.broadcast %8 : vector<1x128xf32> to vector<64x128xf32>
    %82 = arith.addf %80, %81 : vector<64x128xf32>
    %83 = arith.addf %82, %10 : vector<64x128xf32>
    %c0_43 = arith.constant 0 : index
    %c0_44 = arith.constant 0 : index
    %c0_45 = arith.constant 0 : index
    %84 = vector.load %arg14[%c0_43, %c0_44, %c0_45] : memref<1x64x128xf32, #tpu.memory_space<vmem>>, vector<1x64x128xf32>
    %85 = vector.shape_cast %84 : vector<1x64x128xf32> to vector<64x128xf32>
    %86 = vector.shape_cast %83 : vector<64x128xf32> to vector<1x64x128xf32>
    tpu.vector_store %arg14[%c0_43, %c0_44, %c0_45], %86 {strides = array<i32>} : memref<1x64x128xf32, #tpu.memory_space<vmem>>, vector<1x64x128xf32>,
    return
  }
  func.func @transform_0(%arg0: i32) -> (i32, i32, i32) {
    %c0_i32 = arith.constant 0 : i32
    %c0_i32_0 = arith.constant 0 : i32
    %c0_i32_1 = arith.constant 0 : i32
    return %arg0, %c0_i32, %c0_i32_0 : i32, i32, i32
  }
  func.func @transform_1(%arg0: i32) -> (i32, i32) {
    %c0_i32 = arith.constant 0 : i32
    %c0_i32_0 = arith.constant 0 : i32
    %c0_i32_1 = arith.constant 0 : i32
    return %c0_i32, %c0_i32_0 : i32, i32
  }
  func.func @transform_2(%arg0: i32) -> (i32, i32) {
    %c0_i32 = arith.constant 0 : i32
    %c0_i32_0 = arith.constant 0 : i32
    %c0_i32_1 = arith.constant 0 : i32
    return %c0_i32, %c0_i32_0 : i32, i32
  }
  func.func @transform_3(%arg0: i32) -> (i32, i32) {
    %c0_i32 = arith.constant 0 : i32
    %c0_i32_0 = arith.constant 0 : i32
    %c0_i32_1 = arith.constant 0 : i32
    return %c0_i32, %c0_i32_0 : i32, i32
  }
  func.func @transform_4(%arg0: i32) -> (i32, i32) {
    %c0_i32 = arith.constant 0 : i32
    %c0_i32_0 = arith.constant 0 : i32
    %c0_i32_1 = arith.constant 0 : i32
    return %c0_i32, %c0_i32_0 : i32, i32
  }
  func.func @transform_5(%arg0: i32) -> (i32, i32) {
    %c0_i32 = arith.constant 0 : i32
    %c0_i32_0 = arith.constant 0 : i32
    %c0_i32_1 = arith.constant 0 : i32
    return %c0_i32, %c0_i32_0 : i32, i32
  }
  func.func @transform_6(%arg0: i32) -> (i32, i32) {
    %c0_i32 = arith.constant 0 : i32
    %c0_i32_0 = arith.constant 0 : i32
    %c0_i32_1 = arith.constant 0 : i32
    return %c0_i32, %c0_i32_0 : i32, i32
  }
  func.func @transform_7(%arg0: i32) -> (i32, i32) {
    %c0_i32 = arith.constant 0 : i32
    %c0_i32_0 = arith.constant 0 : i32
    %c0_i32_1 = arith.constant 0 : i32
    return %c0_i32, %c0_i32_0 : i32, i32
  }
  func.func @transform_8(%arg0: i32) -> (i32, i32) {
    %c0_i32 = arith.constant 0 : i32
    %c0_i32_0 = arith.constant 0 : i32
    %c0_i32_1 = arith.constant 0 : i32
    return %c0_i32, %c0_i32_0 : i32, i32
  }
  func.func @transform_9(%arg0: i32) -> (i32, i32) {
    %c0_i32 = arith.constant 0 : i32
    %c0_i32_0 = arith.constant 0 : i32
    %c0_i32_1 = arith.constant 0 : i32
    return %c0_i32, %c0_i32_0 : i32, i32
  }
  func.func @transform_10(%arg0: i32) -> (i32, i32) {
    %c0_i32 = arith.constant 0 : i32
    %c0_i32_0 = arith.constant 0 : i32
    %c0_i32_1 = arith.constant 0 : i32
    return %c0_i32, %c0_i32_0 : i32, i32
  }
  func.func @transform_11(%arg0: i32) -> (i32, i32) {
    %c0_i32 = arith.constant 0 : i32
    %c0_i32_0 = arith.constant 0 : i32
    %c0_i32_1 = arith.constant 0 : i32
    return %c0_i32, %c0_i32_0 : i32, i32
  }
  func.func @transform_12(%arg0: i32) -> (i32, i32) {
    %c0_i32 = arith.constant 0 : i32
    %c0_i32_0 = arith.constant 0 : i32
    %c0_i32_1 = arith.constant 0 : i32
    return %c0_i32, %c0_i32_0 : i32, i32
  }
  func.func @transform_13(%arg0: i32) -> (i32, i32, i32) {
    %c0_i32 = arith.constant 0 : i32
    %c0_i32_0 = arith.constant 0 : i32
    %c0_i32_1 = arith.constant 0 : i32
    return %arg0, %c0_i32, %c0_i32_0 : i32, i32, i32
  }
}

</mosaic_0001>

<bundles_post_ra>
// kernel: tpu_custom_call.1
= control target key start
LH: loop header
LB: loop body
LE: loop exit
PB: predicated region body
PF: predicated region fallthrough
CT: control target
= control target key end

     0   :  { %18 = vsyncpa [#allocation3], 0  ;;  %s2157_s0 = inlined_call_operand.vmem [shape: f32[2,64,128], index: 0, kind: input, shape index: {}]   ;;  %s2158_s1 = inlined_call_operand.vmem [shape: f32[1,128], index: 1, kind: input, shape index: {}]   ;;  %s2159_s2 = inlined_call_operand.vmem [shape: f32[1,128], index: 2, kind: input, shape index: {}]   ;;  %s2160_s3 = inlined_call_operand.vmem [shape: bf16[128,128], index: 3, kind: input, shape index: {}]   ;;  %s2161_s4 = inlined_call_operand.vmem [shape: f32[1,128], index: 4, kind: input, shape index: {}]   ;;  %s2162_s5 = inlined_call_operand.vmem [shape: f32[64,1], index: 5, kind: input, shape index: {}]   ;;  %s2163_s6 = inlined_call_operand.vmem [shape: f32[64,1], index: 6, kind: input, shape index: {}]   ;;  %s2164_s7 = inlined_call_operand.hbm [shape: bf16[64,64], index: 7, kind: input, shape index: {}]   ;;  %s2165_s8 = inlined_call_operand.vmem [shape: f32[64,1], index: 8, kind: input, shape index: {}]   ;;  %s2166_s9 = inlined_call_operand.vmem [shape: f32[1,128], index: 9, kind: input, shape index: {}]   ;;  %s2167_s10 = inlined_call_operand.vmem [shape: f32[1,128], index: 10, kind: input, shape index: {}]   ;;  %s2168_s11 = inlined_call_operand.hbm [shape: bf16[128,128], index: 11, kind: input, shape index: {}]   ;;  %s2169_s12 = inlined_call_operand.vmem [shape: f32[1,128], index: 12, kind: input, shape index: {}]   ;;  %s2170_s13 = inlined_call_operand.hbm [shape: f32[2,64,128], index: 13, kind: output, shape index: {}]  }
   0x1   :  { %19 = vsyncpa [#allocation6], 0 }
   0x2   :  { %20 = vsyncpa [#allocation4], 0 }
   0x3   :  { %22 = vsyncpa [#allocation4 + $0x1], 0  ;;  %s1753_s25 = smov 0   ;;  %s1755_s26 = smov 0  }
   0x4   :  { %s1757_s27 = smov 0   ;;  %s1759_s28 = smov 0  }
   0x5 LB: > { %2175 = sst [smem:[#allocation11_spill]] %s1669_s27  ;;  %s1774_s29 = sadd.s32 4294967295, %s1673_s28   ;;  %s1673_s28 = sphi %s1759_s28, %s2187_s28   ;;  %s1669_s27 = sphi %s1757_s27, %s2189_s27   ;;  %s1665_s26 = sphi %s1755_s26, %s2191_s26   ;;  %s1661_s25 = sphi %s1753_s25, %s2190_s25  }
   0x6   : > { %s1322_s30 = sadd.s32 4294967294, %s1673_s28   ;;  %s1778_s14 = sadd.s32 1, %s1673_s28  }
   0x7   : > { %2176 = sst [smem:[#allocation12_spill]] %s1778_s14  ;;  %s313_s15 = sadd.s32 1, %s1669_s27 }
   0x8   : > { %s310_s16 = ssub.s32 %s1673_s28, %s1778_s14  ;;  %p323_p0 = scmp.ne.s32.totalorder %s1669_s27, %s1665_s26 }
   0x9   : > { %p311_p1 = scmp.eq.s32.totalorder %s310_s16, 0  ;;  %p324_p2 = scmp.eq.s32.totalorder %s1774_s29, 1 }
   0xa   : > { %p329_p3 = scmp.ne.s32.totalorder %s1665_s26, %s1661_s25  ;;  %p330_p4 = scmp.eq.s32.totalorder %s1322_s30, 1 }
   0xb   : > { %s1789_s17 = scalar_select %p311_p1, %s1669_s27, %s313_s15  }
   0xc   : > { %p1791_p5 = por %p324_p2, %p323_p0  ;;  %p1795_p6 = por %p330_p4, %p329_p3 }
   0xd   : > { %2177 = sst [smem:[#allocation13_spill]] %s1789_s17  ;;  %p1323_p7 = scmp.ge.s32.totalorder %s1673_s28, 1 }
   0xe   : > { %s2179_s19 = scalar_select %p1795_p6, 1, 0 }
   0xf   : > { %p337_p8 = scmp.lt.s32.totalorder %s1673_s28, 3  ;;  %p2172_p9 = scmp.eq.s32.totalorder %s1774_s29, 0 }
  0x10   : > { %s1675_s21 = smov [#allocation2]   ;;  %s1676_s24 = smov [#allocation5]  }
  0x11   : > { %p1802_p10 = pnand %p1323_p7, %p337_p8  ;;  %s367_s22 = sshll.u32 %s1675_s21, 4  ;;  %s368_s22 = int_to_ptr.vmem [resolvable:$true] %s367_s22 }
  0x12   : > { %s389_s30 = sshll.u32 %s1676_s24, 4  ;;  %s1564_s15 = scalar_lea.vmem %s368_s22, 512  ;;  %s390_s30 = int_to_ptr.vmem [resolvable:$true] %s389_s30 }
  0x13   : > { %p1472_p11 = pneg %p1802_p10  ;;  %p1565_p0 = scmp.ne.s32.totalorder %s368_s22, %s1564_s15 }
  0x14   : > { %p1572_p3 = scmp.lt.s32.totalorder %s368_s22, %s368_s22  ;;  %p1573_p4 = scmp.lt.s32.totalorder %s1564_s15, %s1564_s15 }
  0x15   : > { %p1810_p12 = pnand %p2172_p9, %p1472_p11 }
  0x16   : > { %p1574_p7 = por %p1573_p4, %p1572_p3 }
  0x17   : > { %p1555_p13 = pneg %p1810_p12 }
  0x19   : > { %p1567_p1 = pnand %p1565_p0, %p1555_p13 }
  0x1b   : > { %p1568_p2 = pneg %p1567_p1 }
  0x1d   : > { %p1575_p8 = pnand %p1574_p7, %p1568_p2 }
  0x1f   : > { %1578 = shalt.err (!%p1575_p8)
}
  0x20   : > { %s1677_s16 = smov 64   ;;  %s1678_s21 = smov 4  }
  0x21   : > { %1475 = dma.hbm_to_vmem [thread:$0]  (!%p1810_p12), %s2164_s7, 512, %s368_s22, [#allocation3], %s1677_s16, %s1677_s16, %s1678_s21  }
  0x22   : > { %s1590_s27 = scalar_lea.vmem %s390_s30, 1024  ;;  %p1598_p9 = scmp.lt.s32.totalorder %s390_s30, %s390_s30 }
  0x23   : > { %p1591_p11 = scmp.ne.s32.totalorder %s390_s30, %s1590_s27  ;;  %p1599_p6 = scmp.lt.s32.totalorder %s1590_s27, %s1590_s27 }
  0x25   : > { %p1593_p0 = pnand %p1591_p11, %p1555_p13  ;;  %p1600_p3 = por %p1599_p6, %p1598_p9 }
  0x27   : > { %p1594_p1 = pneg %p1593_p0 }
  0x29   : > { %p1601_p2 = pnand %p1600_p3, %p1594_p1 }
  0x2b   : > { %1604 = shalt.err (!%p1601_p2)
}
  0x2c   : > { %1478 = dma.hbm_to_vmem [thread:$0]  (!%p1810_p12), %s2168_s11, 1024, %s390_s30, [#allocation6], %s1677_s16, %s1677_s16, %s1678_s21  }
  0x2d   : > { %416 = sbr.rel (%p1802_p10) target bundleno = 850 (0x352), region = 72  ;;  %p2182_p4 = scmp.eq.s32.totalorder (!%p1802_p10), %s1774_s29, 0 }
  0x32   : > { %1648 = dma.done.wait (%p2182_p4), [#allocation3], 512   ;;  %p2183_p13 = pmov %p2182_p4 }
  0x33   : > { %p2184_p7 = pmov %p2182_p4 }
  0x34   : > { %1650 = vsyncadd (%p2183_p13), [#allocation3], 4294966784 }
  0x35   : > { %1652 = dma.done.wait (%p2184_p7), [#allocation6], 1024   ;;  %p2185_p6 = pmov %p2182_p4 }
  0x36   : > { %p464_p9 = scmp.lt.s32.totalorder %s1774_s29, 1  ;;  %v1679_v0 = vmov 0   ;;  %v1529_v1 = vld [vmem:[%s2160_s3 + $0x38] sm:$0xff]   ;;  %v1530_v2 = vld [vmem:[%s2160_s3 + $0x30] sm:$0xff]   ;;  %v1531_v3 = vld [vmem:[%s2160_s3 + $0x28] sm:$0xff]   ;;  %vm903_vm0 = vcmask 523264  }
  0x37   : > { %1654 = vsyncadd (%p2185_p6), [#allocation6], 4294966272  ;;  %1528 = vset.pattern.permute.xlu1 %v1679_v0  ;;  %1527 = vset.pattern.permute.xlu0 %v1679_v0  ;;  %v1532_v4 = vld [vmem:[%s2160_s3 + $0x20] sm:$0xff]   ;;  %v487_v14 = vld [vmem:[%s2163_s6 + $0x30] sm:$0xff]  ;;  %s461_s20 = sand.u32 1, %s1665_s26   ;;  %s1365_s24 = sshll.u32 %s1774_s29, 10 }
  0x38   : > { %s465_s27 = scalar_select %p464_p9, %s1774_s29, 1  ;;  %1398 = vmatprep.subr.bf16.mxu0 %v1529_v1  ;;  %v479_v15 = vld [vmem:[%s2162_s5 + $0x30] sm:$0xff]  ;;  %v1533_v16 = vld [vmem:[%s2160_s3 + $0x18] sm:$0xff]   ;;  %807 = vperm.xlu1 %1528, %v487_v14   ;;  %v478_v32 = vld [vmem:[%s2162_s5 + $0x28] sm:$0xff] }
  0x39   : > { %1399 = vmatpush3.bf16.msra.mxu0 %v1529_v1  ;;  %759 = vperm.xlu0 %1527, %v479_v15   ;;  %v488_v21 = vld [vmem:[%s2163_s6 + $0x38] sm:$0xff]  ;;  %v1534_v27 = vld [vmem:[%s2160_s3 + $0x10] sm:$0xff]   ;;  %v1535_v33 = vld [vmem:[%s2160_s3 + $0x8] sm:$0xff]   ;;  %s1330_s30 = sshll.u32 %s461_s20, 6  ;;  %s2117_s29 = scalar_lea.sflag [#allocation4], %s461_s20 }
  0x3a   : > { %s1364_s23 = sshll.u32 %s465_s27, 6  ;;  %1400 = vmatprep.subr.bf16.mxu0 %v1530_v2  ;;  %v480_v25 = vld [vmem:[%s2162_s5 + $0x38] sm:$0xff]  ;;  %v477_v37 = vld [vmem:[%s2162_s5 + $0x20] sm:$0xff]  ;;  %v486_v38 = vld [vmem:[%s2163_s6 + $0x28] sm:$0xff]  ;;  %s2089_s16 = scalar_lea.vmem [#allocation7], %s1330_s30 }
  0x3b   : > { %s1856_s15 = scalar_lea.vmem %s2157_s0, %s1364_s23  ;;  %v485_v42 = vld [vmem:[%s2163_s6 + $0x20] sm:$0xff]  ;;  %v476_v48 = vld [vmem:[%s2162_s5 + $0x18] sm:$0xff]  ;;  %v475_v51 = vld [vmem:[%s2162_s5 + $0x10] sm:$0xff]  ;;  %s1238_s21 = sshll.u32 %s2089_s16, 4  ;;  %s2105_s21 = int_to_ptr.vmem [resolvable:$true] %s1238_s21 }
  0x3c   : > { %v1862_v5 = vld [vmem:[%s1856_s15] sm:$0xff]  ;;  %v1865_v6 = vld [vmem:[%s1856_s15 + $0x8] sm:$0xff]  ;;  %v1868_v7 = vld [vmem:[%s1856_s15 + $0x10] sm:$0xff]  ;;  %812 = vperm.xlu1 %1528, %v488_v21   ;;  %s2112_s27 = scalar_lea.hbm %s2170_s13, %s1365_s24  ;;  %s1605_s17 = scalar_lea.vmem %s2105_s21, 1024 }
  0x3d   : > { %1401 = vmatpush3.bf16.msra.mxu0 %v1530_v2  ;;  %v1871_v8 = vld [vmem:[%s1856_s15 + $0x18] sm:$0xff]  ;;  %v522_v9 = vmul.f32 %v1862_v5, %v1862_v5  ;;  %v508_v10 = vadd.f32 %v1865_v6, %v1862_v5  ;;  %v523_v11 = vmul.f32 %v1865_v6, %v1865_v6  ;;  %v524_v12 = vmul.f32 %v1868_v7, %v1868_v7  ;;  %v1882_v13 = vld [vmem:[%s1856_s15 + $0x20] sm:$0xff]  ;;  %v1897_v20 = vld [vmem:[%s1856_s15 + $0x28] sm:$0xff]  ;;  %p1606_p10 = scmp.ne.s32.totalorder %s2105_s21, %s1605_s17  ;;  %s1680_s22 = smov [#allocation7]  }
  0x3e   : > { %1402 = vmatprep.subr.bf16.mxu0 %v1531_v3  ;;  %v525_v18 = vmul.f32 %v1871_v8, %v1871_v8  ;;  %v526_v23 = vmul.f32 %v1882_v13, %v1882_v13  ;;  %v1909_v26 = vld [vmem:[%s1856_s15 + $0x30] sm:$0xff]  ;;  %v527_v29 = vmul.f32 %v1897_v20, %v1897_v20  ;;  %v1918_v31 = vld [vmem:[%s1856_s15 + $0x38] sm:$0xff]  ;;  %764 = vperm.xlu0 %1527, %v480_v25   ;;  %v1536_v43 = vld [vmem:[%s2160_s3] sm:$0xff]   ;;  %s1609_s23 = sshll.u32 %s1680_s22, 4  ;;  %s1610_s23 = int_to_ptr.vmem [resolvable:$false] %s1609_s23 }
  0x3f   : > { %v509_v17 = vadd.f32 %v508_v10, %v1868_v7  ;;  %v530_v19 = vadd.f32 %v523_v11, %v522_v9  ;;  %v528_v35 = vmul.f32 %v1909_v26, %v1909_v26  ;;  %v529_v40 = vmul.f32 %v1918_v31, %v1918_v31  ;;  %v484_v54 = vld [vmem:[%s2163_s6 + $0x18] sm:$0xff]  ;;  %v483_v57 = vld [vmem:[%s2163_s6 + $0x10] sm:$0xff]  ;;  %v474_v60 = vld [vmem:[%s2162_s5 + $0x8] sm:$0xff]  ;;  %p1607_p12 = pnand %p1606_p10, %p1791_p5  ;;  %s1611_s30 = scalar_lea.vmem %s1610_s23, 2048 }
  0x40   : > { %754 = vperm.xlu1 %1528, %v478_v32   ;;  %v473_v63 = vld [vmem:[%s2162_s5] sm:$0xff]  ;;  %v482_v2 = vld [vmem:[%s2163_s6 + $0x8] sm:$0xff]  ;;  %p1612_p11 = scmp.lt.s32.totalorder %s2105_s21, %s1610_s23  ;;  %p1613_p0 = scmp.lt.s32.totalorder %s1611_s30, %s1605_s17 }
  0x41   : > { %1403 = vmatpush3.bf16.msra.mxu0 %v1531_v3  ;;  %v510_v22 = vadd.f32 %v509_v17, %v1871_v8  ;;  %v531_v24 = vadd.f32 %v530_v19, %v524_v12  ;;  %v481_v9 = vld [vmem:[%s2163_s6] sm:$0xff]  ;;  %v490_v11 = vld [vmem:[%s2165_s8 + $0x8] sm:$0xff]  ;;  %v491_v17 = vld [vmem:[%s2165_s8 + $0x10] sm:$0xff]  ;;  %v553_v19 = vlaneseq  ;;  %p1608_p8 = pneg %p1607_p12 }
  0x42   : > { %1404 = vmatprep.subr.bf16.mxu0 %v1532_v4  ;;  %749 = vperm.xlu0 %1527, %v477_v37   ;;  %v489_v14 = vld [vmem:[%s2165_s8] sm:$0xff]  ;;  %p1614_p1 = por %p1613_p0, %p1612_p11 }
  0x43   : > { %v511_v28 = vadd.f32 %v510_v22, %v1882_v13  ;;  %v532_v30 = vadd.f32 %v531_v24, %v525_v18  ;;  %v494_v18 = vld [vmem:[%s2165_s8 + $0x28] sm:$0xff]  ;;  %v493_v21 = vld [vmem:[%s2165_s8 + $0x20] sm:$0xff]  ;;  %v496_v22 = vld [vmem:[%s2165_s8 + $0x38] sm:$0xff] }
  0x44   : > { %802 = vperm.xlu1 %1528, %v486_v38   ;;  %v495_v24 = vld [vmem:[%s2165_s8 + $0x30] sm:$0xff]  ;;  %v470_v25 = vld [vmem:[%s2158_s1] sm:$0x1]  ;;  %p1615_p3 = pnand %p1614_p1, %p1608_p8 }
  0x45   : > { %1405 = vmatpush3.bf16.msra.mxu0 %v1532_v4  ;;  %v512_v34 = vadd.f32 %v511_v28, %v1897_v20  ;;  %v533_v36 = vadd.f32 %v532_v30, %v526_v23  ;;  %v554_v23 = vshrl.u32 %v553_v19, 7  ;;  %v471_v30 = vld [vmem:[%s2159_s2] sm:$0x1] }
  0x46   : > { %1406 = vmatprep.subr.bf16.mxu0 %v1533_v16  ;;  %797 = vperm.xlu0 %1527, %v485_v42  }
  0x47   : > { %v513_v39 = vadd.f32 %v512_v34, %v1909_v26  ;;  %v534_v41 = vadd.f32 %v533_v36, %v527_v29 }
  0x48   : > { %744 = vperm.xlu1 %1528, %v476_v48  }
  0x49   : > { %1407 = vmatpush3.bf16.msra.mxu0 %v1533_v16  ;;  %v514_v44 = vadd.f32 %v513_v39, %v1918_v31  ;;  %v535_v45 = vadd.f32 %v534_v41, %v528_v35  ;;  %v492_v16 = vld [vmem:[%s2165_s8 + $0x18] sm:$0xff] }
  0x4a   : > { %1408 = vmatprep.subr.bf16.mxu0 %v1534_v27  ;;  %739 = vperm.xlu0 %1527, %v475_v51  }
  0x4b   : > { %v515_v46 = vrot.slane %v514_v44, 4  ;;  %v536_v47 = vadd.f32 %v535_v45, %v529_v40 }
  0x4c   : > { %792 = vperm.xlu1 %1528, %v484_v54  }
  0x4d   : > { %1409 = vmatpush3.bf16.msra.mxu0 %v1534_v27  ;;  %v516_v49 = vadd.f32 %v515_v46, %v514_v44  ;;  %v537_v50 = vrot.slane %v536_v47, 4  ;;  %v1996_v27 = vsub.s32 0, %v554_v23 }
  0x4e   : > { %1410 = vmatprep.subr.bf16.mxu0 %v1535_v33  ;;  %787 = vperm.xlu0 %1527, %v483_v57  }
  0x4f   : > { %v517_v52 = vrot.slane %v516_v49, 2  ;;  %v538_v53 = vadd.f32 %v537_v50, %v536_v47 }
  0x50   : > { %734 = vperm.xlu1 %1528, %v474_v60  }
  0x51   : > { %1411 = vmatpush3.bf16.msra.mxu0 %v1535_v33  ;;  %v518_v55 = vadd.f32 %v517_v52, %v516_v49  ;;  %v539_v56 = vrot.slane %v538_v53, 2 }
  0x52   : > { %1412 = vmatprep.subr.bf16.mxu0 %v1536_v43  ;;  %729 = vperm.xlu0 %1527, %v473_v63  }
  0x53   : > { %v519_v58 = vrot.slane %v518_v55, 1  ;;  %v540_v59 = vadd.f32 %v539_v56, %v538_v53 }
  0x54   : > { %782 = vperm.xlu1 %1528, %v482_v2  }
  0x55   : > { %1413 = vmatpush3.bf16.msra.mxu0 %v1536_v43  ;;  %v520_v61 = vadd.f32 %v519_v58, %v518_v55  ;;  %v541_v62 = vrot.slane %v540_v59, 1 }
  0x56   : > { %777 = vperm.xlu0 %1527, %v481_v9  }
  0x57   : > { %v521_v0 = vmul.f32 0.015625, %v520_v61  ;;  %v542_v1 = vadd.f32 %v541_v62, %v540_v59 }
  0x58   : > { %850 = vperm.xlu1 %1528, %v490_v11  }
  0x59   : > { %v543_v3 = vmul.f32 0.015625, %v542_v1  ;;  %v544_v4 = vmul.f32 %v521_v0, %v521_v0 }
  0x5a   : > { %845 = vperm.xlu0 %1527, %v489_v14  }
  0x5b   : > { %v545_v10 = vsub.f32 %v543_v3, %v544_v4 }
  0x5c   : > { %860 = vperm.xlu1 %1528, %v492_v16  }
  0x5d   : > { %v546_v12 = vmax.f32 %v545_v10, 0.0 }
  0x5e   : > { %855 = vperm.xlu0 %1527, %v491_v17  }
  0x5f   : > { %v547_v15 = vadd.f32 0.001, %v546_v12 }
  0x60   : > { %870 = vperm.xlu1 %1528, %v494_v18  }
  0x61   : > { %1549 = vrsqrt.f32 %v547_v15 }
  0x62   : > { %865 = vperm.xlu0 %1527, %v493_v21   ;;  %v1333_v21 = vld [vmem:[%s2161_s4] ss:$0 sm:$0xff] }
  0x64   : > { %880 = vperm.xlu1 %1528, %v496_v22  }
  0x66   : > { %875 = vperm.xlu0 %1527, %v495_v24  }
  0x6e   : > { %v1550_v28 = vpop.eup %1549 }
  0x6f   : > { %v549_v29 = vmul.f32 %v1550_v28, %v470_v25 }
  0x71   : > { %v550_v32 = vmul.f32 %v549_v29, %v521_v0  ;;  %v556_v33 = vrot.slane %v549_v29, %v1996_v27  ;;  %v1537_v0 = vld [vmem:[#allocation2] sm:$0xff]  }
  0x72   : > { %1430 = vmatprep.mubr.msk.bf16.mxu1 %vm903_vm0, %v1537_v0 }
  0x73   : > { %v551_v34 = vsub.f32 %v471_v30, %v550_v32  ;;  %v558_v35 = vmul.f32 %v556_v33, %v1862_v5  ;;  %v559_v36 = vmul.f32 %v556_v33, %v1865_v6  ;;  %v560_v37 = vmul.f32 %v556_v33, %v1868_v7 }
  0x74   : > { %v561_v38 = vmul.f32 %v556_v33, %v1871_v8  ;;  %v562_v39 = vmul.f32 %v556_v33, %v1882_v13  ;;  %v563_v40 = vmul.f32 %v556_v33, %v1897_v20  ;;  %v564_v42 = vmul.f32 %v556_v33, %v1909_v26 }
  0x75   : > { %v570_v41 = vrot.slane %v551_v34, %v1996_v27  ;;  %v565_v43 = vmul.f32 %v556_v33, %v1918_v31 }
  0x77   : > { %v572_v44 = vadd.f32 %v570_v41, %v558_v35  ;;  %v573_v45 = vadd.f32 %v570_v41, %v559_v36  ;;  %v574_v46 = vadd.f32 %v570_v41, %v560_v37  ;;  %v575_v47 = vadd.f32 %v570_v41, %v561_v38 }
  0x78   : > { %v576_v48 = vadd.f32 %v570_v41, %v562_v39  ;;  %v577_v49 = vadd.f32 %v570_v41, %v563_v40  ;;  %v578_v56 = vadd.f32 %v570_v41, %v564_v42  ;;  %v579_v57 = vadd.f32 %v570_v41, %v565_v43 }
  0x79   : > { %v580_v50 = vmax.f32 %v572_v44, 0.0  ;;  %v581_v51 = vmax.f32 %v573_v45, 0.0  ;;  %v582_v52 = vmax.f32 %v574_v46, 0.0  ;;  %v583_v53 = vmax.f32 %v575_v47, 0.0 }
  0x7a   : > { %v584_v54 = vmax.f32 %v576_v48, 0.0  ;;  %v585_v55 = vmax.f32 %v577_v49, 0.0  ;;  %v586_v61 = vmax.f32 %v578_v56, 0.0  ;;  %v587_v62 = vmax.f32 %v579_v57, 0.0 }
  0x7b   : > { %v588_v58 = vpack.c.bf16 %v581_v51, %v580_v50  ;;  %v589_v59 = vpack.c.bf16 %v583_v53, %v582_v52 }
  0x7c   : > { %v590_v60 = vpack.c.bf16 %v585_v55, %v584_v54  ;;  %v591_v63 = vpack.c.bf16 %v587_v62, %v586_v61 }
  0x7d   : > { %1414 = vmatprep.mubr.bf16.mxu0 %v588_v58 }
  0x7e   : > { %1415 = vmatmul.mubr.bf16.vlgmr.msra.gmra.mxu0 %v589_v59 }
  0x7f   : > { %1418 = vmatprep.mubr.bf16.mxu0 %v590_v60 }
  0x86   : > { %1419 = vmatmul.mubr.bf16.gmra.mxu0 %v591_v63 }
  0xb3   : > { %v808_v1 = vpop.permute.xlu1 %807 }
  0xb4   : > { %v760_v2 = vpop.permute.xlu0 %759 }
  0xb7   : > { %v813_v3 = vpop.permute.xlu1 %812 }
  0xb9   : > { %v765_v4 = vpop.permute.xlu0 %764 }
  0xbb   : > { %v755_v9 = vpop.permute.xlu1 %754 }
  0xbd   : > { %v750_v10 = vpop.permute.xlu0 %749 }
  0xbf   : > { %v803_v11 = vpop.permute.xlu1 %802 }
  0xc1   : > { %v798_v12 = vpop.permute.xlu0 %797 }
  0xc3   : > { %v745_v16 = vpop.permute.xlu1 %744 }
  0xc5   : > { %v740_v18 = vpop.permute.xlu0 %739 }
  0xc7   : > { %v793_v24 = vpop.permute.xlu1 %792 }
  0xc9   : > { %v788_v32 = vpop.permute.xlu0 %787 }
  0xcb   : > { %v735_v43 = vpop.permute.xlu1 %734 }
  0xcd   : > { %v730_v49 = vpop.permute.xlu0 %729 }
  0xcf   : > { %v783_v60 = vpop.permute.xlu1 %782 }
  0xd1   : > { %v778_v0 = vpop.permute.xlu0 %777 }
 0x13e   : > { %v1416_v14 = vpop.f32.mrf.mxu0 }
 0x13f   : > { %v2022_v33 = vadd.f32 %v1416_v14, %v1333_v21  ;;  %v1540_v14 = vld [vmem:[#allocation2 + $0x18] sm:$0xff]  }
 0x140   : > { %v696_v15 = vpop.f32.mrf.mxu0 }
 0x141   : > { %v769_v44 = vmul.f32 %v740_v18, %v2022_v33  ;;  %v2034_v45 = vadd.f32 %v1333_v21, %v696_v15  ;;  %v1541_v15 = vld [vmem:[#allocation5 + $0x38] sm:$0xff]   ;;  %v1544_v18 = vld [vmem:[#allocation5 + $0x20] sm:$0xff]  }
 0x142   : > { %v1417_v17 = vpop.f32.mrf.mxu0 }
 0x143   : > { %v2017_v25 = vadd.f32 %v1417_v17, %v1333_v21  ;;  %v817_v55 = vadd.f32 %v788_v32, %v769_v44  ;;  %v767_v56 = vmul.f32 %v730_v49, %v2034_v45  ;;  %v1543_v17 = vld [vmem:[#allocation5 + $0x28] sm:$0xff]  }
 0x144   : > { %v699_v19 = vpop.f32.mrf.mxu0 }
 0x145   : > { %v770_v37 = vmul.f32 %v745_v16, %v2017_v25  ;;  %v2028_v39 = vadd.f32 %v1333_v21, %v699_v19  ;;  %v1542_v16 = vld [vmem:[#allocation5 + $0x30] sm:$0xff]   ;;  %v1545_v19 = vld [vmem:[#allocation5 + $0x18] sm:$0xff]  }
 0x146   : > { %v1420_v22 = vpop.f32.mrf.mxu0 }
 0x147   : > { %v2015_v23 = vadd.f32 %v1420_v22, %v1333_v21  ;;  %v818_v50 = vadd.f32 %v793_v24, %v770_v37  ;;  %v768_v51 = vmul.f32 %v735_v43, %v2028_v39  ;;  %v1547_v22 = vld [vmem:[#allocation5 + $0x8] sm:$0xff]   ;;  %v1548_v24 = vld [vmem:[#allocation5] sm:$0xff]  }
 0x148   : > { %v712_v28 = vpop.f32.mrf.mxu0 }
 0x149   : > { %v773_v29 = vmul.f32 %v760_v2, %v2015_v23  ;;  %v2020_v30 = vadd.f32 %v1333_v21, %v712_v28  ;;  %v826_v61 = vmax.f32 %v818_v50, 0.0  ;;  %v816_v62 = vadd.f32 %v783_v60, %v768_v51  ;;  %v846_v28 = vpop.permute.xlu0 %845 }
 0x14a   : > { %v1421_v34 = vpop.f32.mrf.mxu0  ;;  %v815_v2 = vadd.f32 %v778_v0, %v767_v56 }
 0x14b   : > { %v771_v35 = vmul.f32 %v750_v10, %v2020_v30  ;;  %v2025_v36 = vadd.f32 %v1421_v34, %v1333_v21  ;;  %v821_v42 = vadd.f32 %v808_v1, %v773_v29  ;;  %v825_v1 = vmax.f32 %v817_v55, 0.0  ;;  %v851_v29 = vpop.permute.xlu1 %850 }
 0x14c   : > { %v715_v38 = vpop.f32.mrf.mxu0 }
 0x14d   : > { %v774_v40 = vmul.f32 %v765_v4, %v2025_v36  ;;  %v2031_v41 = vadd.f32 %v1333_v21, %v715_v38  ;;  %v819_v46 = vadd.f32 %v798_v12, %v771_v35  ;;  %v829_v53 = vmax.f32 %v821_v42, 0.0  ;;  %v1539_v12 = vld [vmem:[#allocation2 + $0x10] sm:$0xff]   ;;  %v856_v32 = vpop.permute.xlu0 %855 }
 0x14e   : > { %v832_v4 = vpack.c.bf16 %v826_v61, %v825_v1  ;;  %v1546_v21 = vld [vmem:[#allocation5 + $0x10] sm:$0xff]  }
 0x14f   : > { %v772_v47 = vmul.f32 %v755_v9, %v2031_v41  ;;  %v822_v48 = vadd.f32 %v813_v3, %v774_v40  ;;  %v827_v57 = vmax.f32 %v819_v46, 0.0  ;;  %v824_v3 = vmax.f32 %v816_v62, 0.0  ;;  %v861_v35 = vpop.permute.xlu1 %860 }
 0x150   : > { %v823_v9 = vmax.f32 %v815_v2, 0.0 }
 0x151   : > { %v820_v52 = vadd.f32 %v803_v11, %v772_v47  ;;  %v830_v54 = vmax.f32 %v822_v48, 0.0  ;;  %v1538_v11 = vld [vmem:[#allocation2 + $0x8] sm:$0xff]   ;;  %v866_v42 = vpop.permute.xlu0 %865 }
 0x152   : > { %v831_v10 = vpack.c.bf16 %v824_v3, %v823_v9 }
 0x153   : > { %v828_v58 = vmax.f32 %v820_v52, 0.0  ;;  %v834_v59 = vpack.c.bf16 %v830_v54, %v829_v53  ;;  %v871_v49 = vpop.permute.xlu1 %870 }
 0x155   : > { %1422 = vmatprep.subr.bf16.mxu1 %v834_v59  ;;  %v833_v63 = vpack.c.bf16 %v828_v58, %v827_v57  ;;  %v876_v55 = vpop.permute.xlu0 %875 }
 0x156   : > { %1423 = vmatpush3.bf16.msra.mxu1 %v834_v59 }
 0x157   : > { %1424 = vmatprep.subr.bf16.mxu1 %v833_v63  ;;  %v881_v62 = vpop.permute.xlu1 %880 }
 0x15a   : > { %1425 = vmatpush3.bf16.msra.mxu1 %v833_v63 }
 0x15b   : > { %1426 = vmatprep.subr.bf16.mxu1 %v832_v4 }
 0x15e   : > { %1427 = vmatpush3.bf16.msra.mxu1 %v832_v4 }
 0x15f   : > { %1428 = vmatprep.subr.bf16.mxu1 %v831_v10 }
 0x162   : > { %1429 = vmatpush3.bf16.msra.mxu1 %v831_v10 }
 0x163   : > { %1438 = vmatprep.subr.bf16.mxu1 %v1541_v15 }
 0x165   : > { %1431 = vmatmul.mubr.msk.bf16.vlgmr.msra.gmra.mxu1 %vm903_vm0, %v1538_v11 }
 0x166   : > { %1434 = vmatprep.mubr.msk.bf16.mxu1 %vm903_vm0, %v1539_v12  ;;  %1439 = vmatpush3.bf16.msra.mxu1 %v1541_v15 }
 0x167   : > { %1440 = vmatprep.subr.bf16.mxu1 %v1542_v16 }
 0x16a   : > { %1441 = vmatpush3.bf16.msra.mxu1 %v1542_v16 }
 0x16b   : > { %1442 = vmatprep.subr.bf16.mxu1 %v1543_v17 }
 0x16d   : > { %1435 = vmatmul.mubr.msk.bf16.gmra.mxu1 %vm903_vm0, %v1540_v14 }
 0x16e   : > { %1443 = vmatpush3.bf16.msra.mxu1 %v1543_v17 }
 0x16f   : > { %1444 = vmatprep.subr.bf16.mxu1 %v1544_v18 }
 0x172   : > { %1445 = vmatpush3.bf16.msra.mxu1 %v1544_v18 }
 0x173   : > { %1446 = vmatprep.subr.bf16.mxu1 %v1545_v19 }
 0x176   : > { %1447 = vmatpush3.bf16.msra.mxu1 %v1545_v19 }
 0x177   : > { %1448 = vmatprep.subr.bf16.mxu1 %v1546_v21 }
 0x17a   : > { %1449 = vmatpush3.bf16.msra.mxu1 %v1546_v21 }
 0x17b   : > { %1450 = vmatprep.subr.bf16.mxu1 %v1547_v22 }
 0x17e   : > { %1451 = vmatpush3.bf16.msra.mxu1 %v1547_v22 }
 0x17f   : > { %1452 = vmatprep.subr.bf16.mxu1 %v1548_v24 }
 0x182   : > { %1453 = vmatpush3.bf16.msra.mxu1 %v1548_v24 }
 0x225   : > { %v1432_v34 = vpop.f32.mrf.mxu1 }
 0x226   : > { %v959_v43 = vadd.f32 %v1432_v34, %v856_v32 }
 0x227   : > { %v950_v37 = vpop.f32.mrf.mxu1 }
 0x228   : > { %v951_v38 = vadd.f32 %v950_v37, %v846_v28  ;;  %v2046_v51 = vadd.f32 %v959_v43, %v2022_v33 }
 0x229   : > { %v1433_v40 = vpop.f32.mrf.mxu1 }
 0x22a   : > { %v962_v44 = vadd.f32 %v1433_v40, %v861_v35  ;;  %v2043_v47 = vadd.f32 %v951_v38, %v2034_v45 }
 0x22b   : > { %v953_v46 = vpop.f32.mrf.mxu1 }
 0x22c   : > { %v954_v48 = vadd.f32 %v953_v46, %v851_v29  ;;  %v2052_v53 = vadd.f32 %v962_v44, %v2017_v25  ;;  %v1003_v56 = vmul.f32 %v2043_v47, %v2043_v47 }
 0x22d   : > { %v1436_v50 = vpop.f32.mrf.mxu1 }
 0x22e   : > { %v2049_v52 = vadd.f32 %v954_v48, %v2028_v39  ;;  %v975_v33 = vadd.f32 %v1436_v50, %v876_v55  ;;  %v1005_v39 = vmul.f32 %v2046_v51, %v2046_v51  ;;  %v1006_v63 = vmul.f32 %v2052_v53, %v2052_v53 }
 0x22f   : > { %v966_v54 = vpop.f32.mrf.mxu1 }
 0x230   : > { %v989_v45 = vadd.f32 %v2049_v52, %v2043_v47  ;;  %v1004_v57 = vmul.f32 %v2049_v52, %v2049_v52  ;;  %v967_v58 = vadd.f32 %v966_v54, %v866_v42  ;;  %v987_v9 = vadd.f32 %v975_v33, %v2015_v23 }
 0x231   : > { %v1437_v59 = vpop.f32.mrf.mxu1 }
 0x232   : > { %v990_v25 = vadd.f32 %v989_v45, %v2046_v51  ;;  %v1011_v60 = vadd.f32 %v1004_v57, %v1003_v56  ;;  %v985_v61 = vadd.f32 %v967_v58, %v2020_v30  ;;  %v978_v3 = vadd.f32 %v1437_v59, %v881_v62  ;;  %v497_v56 = vld [vmem:[%s2166_s9] sm:$0x1] }
 0x233   : > { %v969_v0 = vpop.f32.mrf.mxu1  ;;  %v1009_v18 = vmul.f32 %v987_v9, %v987_v9  ;;  %v498_v58 = vld [vmem:[%s2167_s10] sm:$0x1] }
 0x234   : > { %v1012_v1 = vadd.f32 %v1011_v60, %v1005_v39  ;;  %v991_v2 = vadd.f32 %v990_v25, %v2052_v53  ;;  %v970_v4 = vadd.f32 %v969_v0, %v871_v49  ;;  %v1007_v11 = vmul.f32 %v985_v61, %v985_v61 }
 0x235   : > { %v988_v30 = vadd.f32 %v978_v3, %v2025_v36 }
 0x236   : > { %v992_v10 = vadd.f32 %v991_v2, %v985_v61  ;;  %v1013_v12 = vadd.f32 %v1012_v1, %v1006_v63  ;;  %v986_v14 = vadd.f32 %v970_v4, %v2031_v41 }
 0x237   : > { %v1010_v22 = vmul.f32 %v988_v30, %v988_v30 }
 0x238   : > { %v1014_v15 = vadd.f32 %v1013_v12, %v1007_v11  ;;  %v993_v16 = vadd.f32 %v992_v10, %v986_v14  ;;  %v1008_v17 = vmul.f32 %v986_v14, %v986_v14 }
 0x23a   : > { %v994_v19 = vadd.f32 %v993_v16, %v987_v9  ;;  %v1015_v21 = vadd.f32 %v1014_v15, %v1008_v17 }
 0x23c   : > { %v995_v24 = vadd.f32 %v994_v19, %v988_v30  ;;  %v1016_v28 = vadd.f32 %v1015_v21, %v1009_v18 }
 0x23e   : > { %v996_v29 = vrot.slane %v995_v24, 4  ;;  %v1017_v32 = vadd.f32 %v1016_v28, %v1010_v22 }
 0x240   : > { %v997_v34 = vadd.f32 %v996_v29, %v995_v24  ;;  %v1018_v23 = vrot.slane %v1017_v32, 4 }
 0x242   : > { %v998_v35 = vrot.slane %v997_v34, 2  ;;  %v1019_v37 = vadd.f32 %v1018_v23, %v1017_v32  ;;  %v1350_v32 = vld [vmem:[%s2169_s12] ss:$0 sm:$0xff] }
 0x244   : > { %v999_v38 = vadd.f32 %v998_v35, %v997_v34  ;;  %v1020_v40 = vrot.slane %v1019_v37, 2 }
 0x246   : > { %v1000_v41 = vrot.slane %v999_v38, 1  ;;  %v1021_v42 = vadd.f32 %v1020_v40, %v1019_v37 }
 0x248   : > { %v1001_v43 = vadd.f32 %v1000_v41, %v999_v38  ;;  %v1022_v36 = vrot.slane %v1021_v42, 1 }
 0x24a   : > { %v1002_v44 = vmul.f32 0.015625, %v1001_v43  ;;  %v1023_v46 = vadd.f32 %v1022_v36, %v1021_v42 }
 0x24c   : > { %v1024_v48 = vmul.f32 0.015625, %v1023_v46  ;;  %v1025_v49 = vmul.f32 %v1002_v44, %v1002_v44 }
 0x24e   : > { %v1026_v50 = vsub.f32 %v1024_v48, %v1025_v49 }
 0x250   : > { %v1027_v54 = vmax.f32 %v1026_v50, 0.0 }
 0x252   : > { %v1028_v55 = vadd.f32 0.001, %v1027_v54 }
 0x254   : > { %1551 = vrsqrt.f32 %v1028_v55 }
 0x261   : > { %v1552_v45 = vpop.eup %1551 }
 0x262   : > { %v1030_v57 = vmul.f32 %v1552_v45, %v497_v56 }
 0x264   : > { %v1031_v33 = vmul.f32 %v1030_v57, %v1002_v44  ;;  %v1037_v59 = vrot.slane %v1030_v57, %v1996_v27 }
 0x266   : > { %v1032_v39 = vsub.f32 %v498_v58, %v1031_v33  ;;  %v1039_v25 = vmul.f32 %v1037_v59, %v2043_v47  ;;  %v1040_v62 = vmul.f32 %v1037_v59, %v2049_v52  ;;  %v1041_v63 = vmul.f32 %v1037_v59, %v2046_v51 }
 0x267   : > { %v1042_v0 = vmul.f32 %v1037_v59, %v2052_v53  ;;  %v1044_v1 = vmul.f32 %v1037_v59, %v986_v14  ;;  %v1043_v2 = vmul.f32 %v1037_v59, %v985_v61  ;;  %v1045_v52 = vmul.f32 %v1037_v59, %v987_v9 }
 0x268   : > { %v1051_v60 = vrot.slane %v1032_v39, %v1996_v27  ;;  %v1046_v51 = vmul.f32 %v1037_v59, %v988_v30 }
 0x26a   : > { %v1053_v3 = vadd.f32 %v1051_v60, %v1039_v25  ;;  %v1054_v4 = vadd.f32 %v1051_v60, %v1040_v62  ;;  %v1055_v10 = vadd.f32 %v1051_v60, %v1041_v63  ;;  %v1056_v11 = vadd.f32 %v1051_v60, %v1042_v0 }
 0x26b   : > { %v1057_v12 = vadd.f32 %v1051_v60, %v1043_v2  ;;  %v1058_v15 = vadd.f32 %v1051_v60, %v1044_v1  ;;  %v1059_v14 = vadd.f32 %v1051_v60, %v1045_v52  ;;  %v1060_v61 = vadd.f32 %v1051_v60, %v1046_v51 }
 0x26c   : > { %v1061_v16 = vmax.f32 %v1053_v3, 0.0  ;;  %v1062_v17 = vmax.f32 %v1054_v4, 0.0  ;;  %v1063_v18 = vmax.f32 %v1055_v10, 0.0  ;;  %v1064_v47 = vmax.f32 %v1056_v11, 0.0 }
 0x26d   : > { %v1065_v19 = vmax.f32 %v1057_v12, 0.0  ;;  %v1066_v27 = vmax.f32 %v1058_v15, 0.0  ;;  %v1067_v24 = vmax.f32 %v1059_v14, 0.0  ;;  %v1068_v28 = vmax.f32 %v1060_v61, 0.0 }
 0x26e   : > { %v1069_v21 = vpack.c.bf16 %v1062_v17, %v1061_v16  ;;  %v1070_v53 = vpack.c.bf16 %v1064_v47, %v1063_v18 }
 0x26f   : > { %v1071_v22 = vpack.c.bf16 %v1066_v27, %v1065_v19  ;;  %v1072_v29 = vpack.c.bf16 %v1068_v28, %v1067_v24 }
 0x270   : > { %1454 = vmatprep.mubr.bf16.mxu1 %v1069_v21 }
 0x271   : > { %1455 = vmatmul.mubr.bf16.vlgmr.msra.gmra.mxu1 %v1070_v53 }
 0x272   : > { %1458 = vmatprep.mubr.bf16.mxu1 %v1071_v22 }
 0x279   : > { %1459 = vmatmul.mubr.bf16.gmra.mxu1 %v1072_v29 }
 0x331   : > { %v1456_v9 = vpop.f32.mrf.mxu1 }
 0x332   : > { %v1186_v30 = vadd.f32 %v1456_v9, %v1350_v32 }
 0x333   : > { %v1177_v34 = vpop.f32.mrf.mxu1 }
 0x334   : > { %v1210_v23 = vadd.f32 %v1186_v30, %v1868_v7  ;;  %v1178_v35 = vadd.f32 %v1350_v32, %v1177_v34 }
 0x335   : > { %v1457_v37 = vpop.f32.mrf.mxu1 }
 0x336   : > { %1218 = vst [vmem:[%s2089_s16 + $0x10] sm:$0xff] %v1210_v23  ;;  %v1208_v38 = vadd.f32 %v1178_v35, %v1862_v5  ;;  %v1189_v40 = vadd.f32 %v1457_v37, %v1350_v32 }
 0x337   : > { %v1180_v41 = vpop.f32.mrf.mxu1 }
 0x338   : > { %1216 = vst [vmem:[%s2089_s16] sm:$0xff] %v1208_v38  ;;  %v1211_v42 = vadd.f32 %v1189_v40, %v1871_v8  ;;  %v1181_v7 = vadd.f32 %v1350_v32, %v1180_v41 }
 0x339   : > { %v1460_v43 = vpop.f32.mrf.mxu1 }
 0x33a   : > { %1219 = vst [vmem:[%s2089_s16 + $0x18] sm:$0xff] %v1211_v42  ;;  %v1209_v36 = vadd.f32 %v1181_v7, %v1865_v6  ;;  %v1202_v44 = vadd.f32 %v1460_v43, %v1350_v32 }
 0x33b   : > { %v1193_v46 = vpop.f32.mrf.mxu1 }
 0x33c   : > { %1217 = vst [vmem:[%s2089_s16 + $0x8] sm:$0xff] %v1209_v36  ;;  %v1214_v48 = vadd.f32 %v1202_v44, %v1909_v26  ;;  %v1194_v5 = vadd.f32 %v1350_v32, %v1193_v46 }
 0x33d   : > { %v1461_v49 = vpop.f32.mrf.mxu1 }
 0x33e   : > { %1222 = vst [vmem:[%s2089_s16 + $0x30] sm:$0xff] %v1214_v48  ;;  %v1212_v8 = vadd.f32 %v1194_v5, %v1882_v13  ;;  %v1205_v50 = vadd.f32 %v1461_v49, %v1350_v32 }
 0x33f   : > { %v1196_v54 = vpop.f32.mrf.mxu1 }
 0x340   : > { %1220 = vst [vmem:[%s2089_s16 + $0x20] sm:$0xff] %v1212_v8  ;;  %v1215_v6 = vadd.f32 %v1205_v50, %v1918_v31  ;;  %v1197_v55 = vadd.f32 %v1350_v32, %v1196_v54 }
 0x342   : > { %1223 = vst [vmem:[%s2089_s16 + $0x38] sm:$0xff] %v1215_v6  ;;  %v1213_v26 = vadd.f32 %v1197_v55, %v1897_v20 }
 0x344   : > { %1221 = vst [vmem:[%s2089_s16 + $0x28] sm:$0xff] %v1213_v26 }
 0x345   : > { %1618 = shalt.err (!%p1615_p3)
}
 0x346   : > { %s1619_s20 = scalar_lea.hbm %s2112_s27, 1024  ;;  %s1623_s15 = scalar_lea.hbm %s2170_s13, 2048 }
 0x347   : > { %p1620_p2 = scmp.ne.s32.totalorder %s2112_s27, %s1619_s20  ;;  %p1624_p7 = scmp.lt.s32.totalorder %s2112_s27, %s2170_s13 }
 0x348   : > { %p1625_p6 = scmp.lt.s32.totalorder %s1623_s15, %s1619_s20 }
 0x349   : > { %p1621_p4 = pnand %p1620_p2, %p1791_p5 }
 0x34a   : > { %p1626_p9 = por %p1625_p6, %p1624_p7 }
 0x34b   : > { %p1622_p13 = pneg %p1621_p4 }
 0x34d   : > { %p1627_p10 = pnand %p1626_p9, %p1622_p13 }
 0x34f   : > { %1630 = shalt.err (!%p1627_p10)
}
 0x350   : > { %s1681_s17 = smov 128   ;;  %s1682_s23 = smov 8  }
 0x351   : > { %1470 = dma.vmem_to_hbm [thread:$0]  (%p1791_p5), %s2105_s21, 1024, %s2112_s27, %s2117_s29, %s1681_s17, %s1681_s17, %s1682_s23  }
 0x352 PF: > { %p1487_p12 = scmp.ge.s32.totalorder %s1673_s28, 2  ;;  %s1253_s30 = sand.u32 1, %s1661_s25  }
 0x353   : > { %p2186_p8 = scmp.ne.s32.totalorder %s2179_s19, 0  ;;  %s1254_s20 = scalar_lea.sflag [#allocation4], %s1253_s30 }
 0x355   : > { %p1480_p11 = pnand %p1487_p12, %p2186_p8 }
 0x357   : > { %p1481_p0 = pneg %p1480_p11 }
 0x359   : > { %1656 = dma.done.wait (%p1481_p0), %s1254_s20, 1024  }
 0x35a   : > { %1658 = vsyncadd (%p1481_p0), %s1254_s20, 4294966272  ;;  %s2187_s28 = sld [smem:[#allocation12_spill]]  ;;  %s2190_s25 = smov %s1665_s26 }
 0x35b   : > { %s2188_s16 = sld [smem:[#allocation11_spill]] }
 0x35c   : > { %s2189_s27 = sld [smem:[#allocation13_spill]] }
 0x360   : > { %p25_p1 = scmp.ge.s32.totalorder %s2187_s28, 4  }
 0x361   : > { %s2191_s26 = smov %s2188_s16 }
 0x362   :  { %27 = sbr.rel (!%p25_p1) target bundleno = 5 (0x5), region = 116 }
 0x367   :  { %1259 = vsyncpa [#allocation3], 1 }
 0x368   :  { %1261 = vsyncpa [#allocation3 + $0x1], 1 }
 0x369   :  { %1262 = vsyncpa [#allocation6], 1 }
 0x36a   :  { %1263 = vsyncpa [#allocation4], 1 }
 0x36b   :  { %1265 = vsyncpa [#allocation4 + $0x1], 1 }

</bundles_post_ra>
